<compile_context>
chip_gen: v7x
topology: tpu7x:2x2x1
jax: 0.10.0
libtpu: 0.0.40
codegen_flags: <defaults>
</compile_context>

<pallas_src>
import functools

import jax
import jax.numpy as jnp
from jax.experimental import pallas as pl
from jax.experimental.pallas import tpu as pltpu

CHARPROTLEN = 25     # protein alphabet size (as in DeepDTA)
CHARCANSMILEN = 64   # canonical SMILES alphabet size


def _round_up(x, m):
    return (x + m - 1) // m * m


def _pick_tile(dim, cap, step=128):
    """Largest multiple of `step` that divides `dim` and is <= cap."""
    best = min(step, dim)
    t = step
    while t <= min(cap, dim):
        if dim % t == 0:
            best = t
        t += step
    return best


# --------------------------------------------------------------------------
# Tiled GEMM + bias + activation (MXU, bf16 operands, f32 accumulation)
# --------------------------------------------------------------------------
def _gemm_kernel(x_ref, w_ref, b_ref, o_ref, acc_ref, *, relu):
    @pl.when(pl.program_id(2) == 0)
    def _():
        acc_ref[...] = jnp.zeros_like(acc_ref)

    acc_ref[...] += jnp.dot(x_ref[...], w_ref[...],
                            preferred_element_type=jnp.float32)

    @pl.when(pl.program_id(2) == pl.num_programs(2) - 1)
    def _():
        out = acc_ref[...] + b_ref[...]      # (1,tn) or (tm,1) broadcasts
        if relu:
            out = jnp.maximum(out, 0.0)
        o_ref[...] = out.astype(o_ref.dtype)


def _tiled_gemm(a, bmat, bias, *, tm, tn, tk, relu, out_dtype, bias_per_row):
    """a:(Mp,Kp) bf16, bmat:(Kp,Np) bf16, bias f32 of shape (1,Np) or (Mp,1)."""
    Mp, Kp = a.shape
    Kp2, Np = bmat.shape
    assert Kp == Kp2 and Mp % tm == 0 and Np % tn == 0 and Kp % tk == 0
    grid = (Mp // tm, Np // tn, Kp // tk)

    if bias_per_row:
        b_spec = pl.BlockSpec((tm, 1), lambda i, j, k: (i, 0))
    else:
        b_spec = pl.BlockSpec((1, tn), lambda i, j, k: (0, j))

    out_isize = jnp.dtype(out_dtype).itemsize
    # Double-buffered inputs + double-buffered output + f32 accumulator.
    vmem_est = (2 * (tm * tk * 2 + tk * tn * 2) + 2 * tm * tn * out_isize
                + tm * tn * 4 + 2 * max(tm, tn) * 4)
    vmem_limit = int(min(max(4 * vmem_est, 32 * 1024 * 1024), 48 * 1024 * 1024))

    cost = pl.CostEstimate(
        flops=2 * Mp * Np * Kp,
        transcendentals=0,
        bytes_accessed=Mp * Kp * 2 + Kp * Np * 2 + Mp * Np * out_isize,
    )

    return pl.pallas_call(
        functools.partial(_gemm_kernel, relu=relu),
        out_shape=jax.ShapeDtypeStruct((Mp, Np), out_dtype),
        grid_spec=pltpu.PrefetchScalarGridSpec(
            num_scalar_prefetch=0,
            grid=grid,
            in_specs=[
                pl.BlockSpec((tm, tk), lambda i, j, k: (i, k)),
                pl.BlockSpec((tk, tn), lambda i, j, k: (k, j)),
                b_spec,
            ],
            out_specs=pl.BlockSpec((tm, tn), lambda i, j, k: (i, j)),
            scratch_shapes=[pltpu.VMEM((tm, tn), jnp.float32)],
        ),
        compiler_params=pltpu.CompilerParams(
            dimension_semantics=("parallel", "parallel", "arbitrary"),
            vmem_limit_bytes=vmem_limit,
        ),
        cost_estimate=cost,
    )(a, bmat, bias)


def gemm_bias_act(x, wp, bp, *, relu, out_dtype=jnp.float32, n_valid=None):
    """y = act(x @ w + b).  x:(M,K) activations; wp:(Kp,Np) pre-padded bf16
    weight (zero rows beyond K); bp:(1,Np) f32 bias.  Returns (M, n_valid)."""
    M, K = x.shape
    Kp, Np = wp.shape
    assert K <= Kp
    n_valid = Np if n_valid is None else n_valid

    tm = 256 if M >= 256 else _round_up(M, 8)
    Mp = _round_up(M, tm)
    tn = _pick_tile(Np, 512)
    tk = _pick_tile(Kp, 1024)

    xb = x.astype(jnp.bfloat16)
    if (Mp, Kp) != (M, K):
        xb = jnp.pad(xb, ((0, Mp - M), (0, Kp - K)))

    out = _tiled_gemm(xb, wp, bp, tm=tm, tn=tn, tk=tk, relu=relu,
                      out_dtype=out_dtype, bias_per_row=False)
    if (Mp, Np) != (M, n_valid):
        out = out[:M, :n_valid]
    return out


# --------------------------------------------------------------------------
# Conv2d(stride=4)+ReLU as a transposed GEMM (spatial axis on lanes)
# --------------------------------------------------------------------------
def conv2d_relu_chwb(a, conv):
    """a: (Cin, H, W, B) bf16 activations.  conv dict holds the prepped
    (Cout_p, Kp) bf16 weight matrix and (Cout_p, 1) f32 bias.
    Returns (Cout, OH, OW, B) bf16 with ReLU fused."""
    Cin, H, W, B = a.shape
    k, s, p = conv["k"], conv["stride"], conv["pad"]
    Cout = conv["cout"]
    wp, bp = conv["w"], conv["b"]
    Mp, Kp = wp.shape
    assert Cin == conv["cin"]

    OH = (H + 2 * p - k) // s + 1
    OW = (W + 2 * p - k) // s + 1

    ap = jnp.pad(a, ((0, 0), (p, p), (p, p), (0, 0)))
    ridx = jnp.arange(k)[:, None] + (jnp.arange(OH) * s)[None, :]   # (k, OH)
    cidx = jnp.arange(k)[:, None] + (jnp.arange(OW) * s)[None, :]   # (k, OW)
    # Direct gather to (Cin, k, k, OH, OW, B): row order (cin, kh, kw) matches
    # the weight reshape; no 6-D transpose needed.
    patches = ap[:, ridx[:, None, :, None], cidx[None, :, None, :], :]
    n = OH * OW * B
    pm = patches.reshape(Cin * k * k, n)

    # Pad K rows to the weight's padded K (weight's extra columns are zero) and
    # lane/N columns to a 128 multiple so output stores stay unmasked.
    Np = _round_up(n, 128)
    pm = jnp.pad(pm, ((0, Kp - Cin * k * k), (0, Np - n)))

    tm = Mp if Mp <= 256 else 256
    tn = _pick_tile(Np, 512)
    tk = _pick_tile(Kp, 1024)
    out = _tiled_gemm(wp, pm, bp, tm=tm, tn=tn, tk=tk, relu=True,
                      out_dtype=jnp.bfloat16, bias_per_row=True)
    return out[:Cout, :n].reshape(Cout, OH, OW, B)


# --------------------------------------------------------------------------
# Bidirectional LSTM recurrence: grid=(T,), VMEM-carried state
# --------------------------------------------------------------------------
def _bilstm_step_kernel(xpf_ref, xpb_ref, whhf_ref, whhb_ref,
                        of_ref, ob_ref, hf, hb, cf, cb, *, H):
    t = pl.program_id(0)

    @pl.when(t == 0)
    def _():
        hf[...] = jnp.zeros_like(hf)
        hb[...] = jnp.zeros_like(hb)
        cf[...] = jnp.zeros_like(cf)
        cb[...] = jnp.zeros_like(cb)

    # Two separate (N,H)x(H,4H) recurrent dots (no block-diagonal zero FLOPs).
    ghf = jnp.dot(hf[...].astype(jnp.bfloat16), whhf_ref[...],
                  preferred_element_type=jnp.float32)
    ghb = jnp.dot(hb[...].astype(jnp.bfloat16), whhb_ref[...],
                  preferred_element_type=jnp.float32)
    gf = xpf_ref[0].astype(jnp.float32) + ghf        # (N, 4H)
    gb = xpb_ref[0].astype(jnp.float32) + ghb

    def update(g, c):
        i = jax.nn.sigmoid(g[:, 0 * H:1 * H])
        f = jax.nn.sigmoid(g[:, 1 * H:2 * H])
        gg = jnp.tanh(g[:, 2 * H:3 * H])
        o = jax.nn.sigmoid(g[:, 3 * H:4 * H])
        c_new = f * c + i * gg
        h_new = o * jnp.tanh(c_new)
        return h_new, c_new

    hf_new, cf_new = update(gf, cf[...])
    hb_new, cb_new = update(gb, cb[...])
    hf[...] = hf_new
    cf[...] = cf_new
    hb[...] = hb_new
    cb[...] = cb_new

    of_ref[0] = jnp.maximum(hf_new, 0.0)
    ob_ref[0] = jnp.maximum(hb_new, 0.0)


def bilstm_recurrence(xpf, xpb, whh_f, whh_b, *, H):
    """xpf/xpb: (T, N, 4H) bf16 precomputed x@Wih + (b_ih+b_hh) per direction.
    whh_*: (H, 4H) bf16.  Returns relu'd fwd/bwd outputs, each (T, N, H) f32."""
    T, N, _ = xpf.shape
    return pl.pallas_call(
        functools.partial(_bilstm_step_kernel, H=H),
        out_shape=(jax.ShapeDtypeStruct((T, N, H), jnp.float32),
                   jax.ShapeDtypeStruct((T, N, H), jnp.float32)),
        grid=(T,),
        in_specs=[
            pl.BlockSpec((1, N, 4 * H), lambda t: (t, 0, 0)),
            pl.BlockSpec((1, N, 4 * H), lambda t: (T - 1 - t, 0, 0)),
            pl.BlockSpec((H, 4 * H), lambda t: (0, 0)),
            pl.BlockSpec((H, 4 * H), lambda t: (0, 0)),
        ],
        out_specs=(
            pl.BlockSpec((1, N, H), lambda t: (t, 0, 0)),
            pl.BlockSpec((1, N, H), lambda t: (T - 1 - t, 0, 0)),
        ),
        scratch_shapes=[pltpu.VMEM((N, H), jnp.float32)] * 4,
        compiler_params=pltpu.CompilerParams(
            dimension_semantics=("arbitrary",)),
    )(xpf, xpb, whh_f, whh_b)


# --------------------------------------------------------------------------
# Final interaction layer (N=1): VPU multiply + row-reduction, not a GEMM.
# --------------------------------------------------------------------------
def _vecdot_bias_kernel(x_ref, w_ref, b_ref, o_ref):
    x = x_ref[...].astype(jnp.float32)
    w = w_ref[...]                                    # (1, K) broadcasts
    o_ref[...] = jnp.sum(x * w, axis=1, keepdims=True) + b_ref[...]


def vecdot_bias(x, w_row, b):
    M, K = x.shape
    return pl.pallas_call(
        _vecdot_bias_kernel,
        out_shape=jax.ShapeDtypeStruct((M, 1), jnp.float32),
        grid=(1,),
        in_specs=[
            pl.BlockSpec((M, K), lambda i: (0, 0)),
            pl.BlockSpec((1, K), lambda i: (0, 0)),
            pl.BlockSpec((1, 1), lambda i: (0, 0)),
        ],
        out_specs=pl.BlockSpec((M, 1), lambda i: (0, 0)),
        compiler_params=pltpu.CompilerParams(dimension_semantics=("arbitrary",)),
    )(x.astype(jnp.float32), w_row, b)


# --------------------------------------------------------------------------
# Parameter construction: bf16 cast + tile padding hoisted to init
# --------------------------------------------------------------------------
def _prep_linear(w, b):
    """w:(K,N) f32, b:(N,) f32 -> pre-padded bf16 weight + f32 row bias."""
    K, N = w.shape
    Kp, Np = _round_up(K, 128), _round_up(N, 128)
    wp = jnp.pad(w.astype(jnp.bfloat16), ((0, Kp - K), (0, Np - N)))
    bp = jnp.pad(jnp.asarray(b, jnp.float32).reshape(1, -1),
                 ((0, 0), (0, Np - N)))
    return {"w": wp, "b": bp, "n": N}


def _prep_conv(w, b, *, stride, pad):
    """w:(Cout,Cin,K,K) f32, b:(Cout,).  Weight matrix is the GEMM *LHS*:
    rows = Cout (padded to 8), cols = Cin*K*K (padded to 128)."""
    Cout, Cin, K, _ = w.shape
    kk = Cin * K * K
    Mp, Kp = _round_up(Cout, 8), _round_up(kk, 128)
    wm = jnp.pad(w.reshape(Cout, kk).astype(jnp.bfloat16),
                 ((0, Mp - Cout), (0, Kp - kk)))
    bp = jnp.pad(jnp.asarray(b, jnp.float32).reshape(-1, 1),
                 ((0, Mp - Cout), (0, 0)))
    return {"w": wm, "b": bp, "cout": Cout, "cin": Cin, "k": K,
            "stride": stride, "pad": pad}


def init_params(key, *, seqlen, smilen, dim, layer_cnn, layer_output):
    keys = iter(jax.random.split(key, 128))

    def u(shape, scale=0.1):
        return jax.random.uniform(next(keys), shape, jnp.float32, -1.0, 1.0) * scale

    params = {
        "embed_word": u((CHARPROTLEN, dim)),
        "embed_smile": u((CHARCANSMILEN, dim)),
    }

    convs = []
    h, w_ = seqlen, dim
    for i in range(layer_cnn):
        cin = 1 if i == 0 else 2 ** (i + 1)
        cout = 2 ** (i + 2)
        k = 2 * (i + 2) + 1
        p = i + 2
        convs.append(_prep_conv(u((cout, cin, k, k)), u((cout,)),
                                stride=4, pad=p))
        h = (h + 2 * p - k) // 4 + 1
        w_ = (w_ + 2 * p - k) // 4 + 1
    params["convs"] = convs

    H = dim
    params["lstm"] = {
        # weights stored pre-transposed for x @ W; b stands for b_ih + b_hh
        "wih_f": _prep_linear(u((dim, 4 * H)), u((4 * H,))),
        "wih_b": _prep_linear(u((dim, 4 * H)), u((4 * H,))),
        "whh_f": u((H, 4 * H)).astype(jnp.bfloat16),
        "whh_b": u((H, 4 * H)).astype(jnp.bfloat16),
    }

    cnn_flat = (2 ** (layer_cnn + 1)) * h * w_
    rnn_flat = 2 * smilen * dim
    total = cnn_flat + rnn_flat

    outs, in_f = [], total
    for j in range(layer_output):
        out_f = int(total / (j + 2))
        outs.append(_prep_linear(u((in_f, out_f)), u((out_f,))))
        in_f = out_f
    params["outs"] = outs
    params["inter"] = {"w": u((1, in_f)), "b": u((1, 1))}
    return params


# --------------------------------------------------------------------------
# Forward pass (mirrors DeepDTAModified.forward)
# --------------------------------------------------------------------------
def deepdta_forward(params, words, smiles):
    B = words.shape[0]

    # TODO(synk): embedding gathers are pure data movement; kept in plain JAX.
    word_vectors = jnp.take(params["embed_word"], words, axis=0)      # (B,SEQLEN,dim)
    smile_vectors = jnp.take(params["embed_smile"], smiles, axis=0)   # (B,SMILEN,dim)

    # --- attention_cnn: unsqueeze(1) -> stacked Conv2d+ReLU -> flatten ---
    # Channels-first (C, H, W, B) bf16 layout; single final permute restores the
    # PyTorch NCHW flatten order.
    xs = jnp.transpose(word_vectors.astype(jnp.bfloat16), (1, 2, 0))[None]  # (1,H,W,B)
    for conv in params["convs"]:
        xs = conv2d_relu_chwb(xs, conv)
    protein_vector = jnp.transpose(xs, (3, 0, 1, 2)).reshape(B, -1).astype(jnp.float32)

    # --- rnn: bidirectional LSTM + ReLU + flatten ---
    # Batch axis acts as the LSTM time axis (PyTorch batch_first=False quirk).
    lstm = params["lstm"]
    T, N, D = smile_vectors.shape
    H = D
    x2d = smile_vectors.reshape(T * N, D)
    xpf = gemm_bias_act(x2d, lstm["wih_f"]["w"], lstm["wih_f"]["b"], relu=False,
                        out_dtype=jnp.bfloat16, n_valid=4 * H).reshape(T, N, 4 * H)
    xpb = gemm_bias_act(x2d, lstm["wih_b"]["w"], lstm["wih_b"]["b"], relu=False,
                        out_dtype=jnp.bfloat16, n_valid=4 * H).reshape(T, N, 4 * H)
    out_f, out_b = bilstm_recurrence(xpf, xpb, lstm["whh_f"], lstm["whh_b"], H=H)
    after_smile_vectors = jnp.concatenate([out_f, out_b], axis=-1).reshape(B, -1)

    # --- concat, squeeze, output MLP, interaction ---
    cat_vector = jnp.concatenate([protein_vector, after_smile_vectors], axis=1)
    cat_vector = jnp.squeeze(cat_vector)              # no-op for B > 1 (as in torch)
    if cat_vector.ndim == 1:
        cat_vector = cat_vector[None, :]
    for lin in params["outs"]:
        cat_vector = gemm_bias_act(cat_vector, lin["w"], lin["b"], relu=True,
                                   out_dtype=jnp.float32, n_valid=lin["n"])
    return vecdot_bias(cat_vector, params["inter"]["w"], params["inter"]["b"])


# --------------------------------------------------------------------------
if __name__ == "__main__":
    B = 2
    SEQLEN, SMILEN, DIM = 64, 16, 16        # small stand-ins for davis/kiba sizes
    LAYER_CNN, LAYER_OUTPUT = 2, 2

    key = jax.random.PRNGKey(0)
    k_params, k_words, k_smiles = jax.random.split(key, 3)
    params = init_params(k_params, seqlen=SEQLEN, smilen=SMILEN, dim=DIM,
                         layer_cnn=LAYER_CNN, layer_output=LAYER_OUTPUT)
    words = jax.random.randint(k_words, (B, SEQLEN), 0, CHARPROTLEN, dtype=jnp.int32)
    smiles = jax.random.randint(k_smiles, (B, SMILEN), 0, CHARCANSMILEN, dtype=jnp.int32)

    out = deepdta_forward(params, words, smiles)
    out = jax.block_until_ready(out)
    assert out.shape == (B, 1) and out.dtype == jnp.float32
    print("KERNEL_OK")
</pallas_src>

<mosaic_0001>
module attributes {stable_mosaic.version = 11 : i64} {
  func.func @_gemm_kernel(%arg0: i32, %arg1: i32, %arg2: i32, %arg3: memref<8x128xbf16, #tpu.memory_space<vmem>>, %arg4: memref<128x128xbf16, #tpu.memory_space<vmem>>, %arg5: memref<8x1xf32, #tpu.memory_space<vmem>>, %arg6: memref<8x128xbf16, #tpu.memory_space<vmem>>, %arg7: memref<8x128xf32, #tpu.memory_space<vmem>>) attributes {dimension_semantics = [#tpu.dimension_semantics<parallel>, #tpu.dimension_semantics<parallel>, #tpu.dimension_semantics<arbitrary>], iteration_bounds = array<i64: 1, 1, 1>, scalar_prefetch = 0 : i64, scratch_operands = 1 : i64, tpu.core_type = #tpu.core_type<tc>, window_params = [{transform_indices = @transform_0, window_bounds = array<i64: 8, 128>}, {transform_indices = @transform_1, window_bounds = array<i64: 128, 128>}, {transform_indices = @transform_2, window_bounds = array<i64: 8, 1>}, {transform_indices = @transform_3, window_bounds = array<i64: 8, 128>}]} {
    %c0_i32 = arith.constant 0 : i32
    %0 = arith.cmpi eq, %arg2, %c0_i32 : i32
    %1 = arith.extui %0 : i1 to i32
    %c0_i32_0 = arith.constant 0 : i32
    %2 = arith.cmpi ne, %1, %c0_i32_0 : i32
    scf.if %2 {
      %cst_10 = arith.constant 0.000000e+00 : f32
      %12 = vector.broadcast %cst_10 : f32 to vector<8x128xf32>
      %c0_11 = arith.constant 0 : index
      %c0_12 = arith.constant 0 : index
      %13 = vector.load %arg7[%c0_11, %c0_12] : memref<8x128xf32, #tpu.memory_space<vmem>>, vector<8x128xf32>
      tpu.vector_store %arg7[%c0_11, %c0_12], %12 {strides = array<i32>} : memref<8x128xf32, #tpu.memory_space<vmem>>, vector<8x128xf32>,
    } else {
    }
    %c0 = arith.constant 0 : index
    %c0_1 = arith.constant 0 : index
    %3 = vector.load %arg7[%c0, %c0_1] : memref<8x128xf32, #tpu.memory_space<vmem>>, vector<8x128xf32>
    %c0_2 = arith.constant 0 : index
    %c0_3 = arith.constant 0 : index
    %4 = vector.load %arg3[%c0_2, %c0_3] : memref<8x128xbf16, #tpu.memory_space<vmem>>, vector<8x128xbf16>
    %c0_4 = arith.constant 0 : index
    %c0_5 = arith.constant 0 : index
    %5 = vector.load %arg4[%c0_4, %c0_5] : memref<128x128xbf16, #tpu.memory_space<vmem>>, vector<128x128xbf16>
    %cst = arith.constant dense<0.000000e+00> : vector<8x128xf32>
    %6 = tpu.matmul %4, %5, %cst {dimension_numbers = #tpu.dot_dimension_numbers<[1], [0], [0], [1], [0, 0, 1, 1], [], []>} : vector<8x128xbf16>, vector<128x128xbf16>, vector<8x128xf32> -> vector<8x128xf32>
    %7 = arith.addf %3, %6 : vector<8x128xf32>
    %c0_6 = arith.constant 0 : index
    %c0_7 = arith.constant 0 : index
    %8 = vector.load %arg7[%c0_6, %c0_7] : memref<8x128xf32, #tpu.memory_space<vmem>>, vector<8x128xf32>
    tpu.vector_store %arg7[%c0_6, %c0_7], %7 {strides = array<i32>} : memref<8x128xf32, #tpu.memory_space<vmem>>, vector<8x128xf32>,
    %c0_i32_8 = arith.constant 0 : i32
    %9 = arith.cmpi eq, %arg2, %c0_i32_8 : i32
    %10 = arith.extui %9 : i1 to i32
    %c0_i32_9 = arith.constant 0 : i32
    %11 = arith.cmpi ne, %10, %c0_i32_9 : i32
    scf.if %11 {
      %c0_10 = arith.constant 0 : index
      %c0_11 = arith.constant 0 : index
      %12 = vector.load %arg7[%c0_10, %c0_11] : memref<8x128xf32, #tpu.memory_space<vmem>>, vector<8x128xf32>
      %c0_12 = arith.constant 0 : index
      %c0_13 = arith.constant 0 : index
      %13 = vector.load %arg5[%c0_12, %c0_13] : memref<8x1xf32, #tpu.memory_space<vmem>>, vector<8x1xf32>
      %14 = vector.broadcast %13 : vector<8x1xf32> to vector<8x128xf32>
      %15 = arith.addf %12, %14 : vector<8x128xf32>
      %cst_14 = arith.constant 0.000000e+00 : f32
      %16 = vector.broadcast %cst_14 : f32 to vector<8x128xf32>
      %17 = arith.maximumf %15, %16 : vector<8x128xf32>
      %18 = arith.truncf %17 : vector<8x128xf32> to vector<8x128xbf16>
      %c0_15 = arith.constant 0 : index
      %c0_16 = arith.constant 0 : index
      %19 = vector.load %arg6[%c0_15, %c0_16] : memref<8x128xbf16, #tpu.memory_space<vmem>>, vector<8x128xbf16>
      tpu.vector_store %arg6[%c0_15, %c0_16], %18 {strides = array<i32>} : memref<8x128xbf16, #tpu.memory_space<vmem>>, vector<8x128xbf16>,
    } else {
    }
    return
  }
  func.func @transform_0(%arg0: i32, %arg1: i32, %arg2: i32) -> (i32, i32) {
    %c0_i32 = arith.constant 0 : i32
    return %arg0, %arg2 : i32, i32
  }
  func.func @transform_1(%arg0: i32, %arg1: i32, %arg2: i32) -> (i32, i32) {
    %c0_i32 = arith.constant 0 : i32
    return %arg2, %arg1 : i32, i32
  }
  func.func @transform_2(%arg0: i32, %arg1: i32, %arg2: i32) -> (i32, i32) {
    %c0_i32 = arith.constant 0 : i32
    %c0_i32_0 = arith.constant 0 : i32
    return %arg0, %c0_i32 : i32, i32
  }
  func.func @transform_3(%arg0: i32, %arg1: i32, %arg2: i32) -> (i32, i32) {
    %c0_i32 = arith.constant 0 : i32
    return %arg0, %arg1 : i32, i32
  }
}

</mosaic_0001>

<bundles_post_ra>
// kernel: tpu_custom_call.1
= control target key start
LH: loop header
LB: loop body
LE: loop exit
PB: predicated region body
PF: predicated region fallthrough
CT: control target
= control target key end

     0   :  { %8 = vsyncpa [#allocation4], 0  ;;  %s330_s0 = inlined_call_operand.vmem [shape: bf16[8,128], index: 0, kind: input, shape index: {}]   ;;  %s331_s1 = inlined_call_operand.hbm [shape: bf16[128,128], index: 1, kind: input, shape index: {}]   ;;  %s332_s2 = inlined_call_operand.vmem [shape: f32[8,1], index: 2, kind: input, shape index: {}]   ;;  %s333_s3 = inlined_call_operand.hbm [shape: bf16[8,128], index: 3, kind: output, shape index: {}]  }
   0x1   :  { %9 = vsyncpa [#allocation5], 0  ;;  %s273_s12 = smov [#allocation3]   ;;  %s225_s16 = scalar_lea.hbm %s331_s1, 1024 }
   0x2   :  { %s17_s13 = sshll.u32 %s273_s12, 4  ;;  %p226_p0 = scmp.ne.s32.totalorder %s331_s1, %s225_s16  ;;  %s18_s13 = int_to_ptr.vmem [resolvable:$true] %s17_s13 }
   0x3   :  { %p229_p1 = scmp.lt.u32.totalorder %s225_s16, %s331_s1 }
   0x5   :  { %p231_p2 = pnand %p229_p1, %p226_p0 }
   0x7   :  { %234 = shalt.err (!%p231_p2)
}
   0x8   :  { %s235_s21 = scalar_lea.vmem %s18_s13, 1024  ;;  %p240_p4 = scmp.lt.s32.totalorder %s18_s13, %s18_s13 }
   0x9   :  { %p236_p3 = scmp.ne.s32.totalorder %s18_s13, %s235_s21  ;;  %p241_p5 = scmp.lt.s32.totalorder %s235_s21, %s235_s21 }
   0xb   :  { %p242_p6 = por %p241_p5, %p240_p4 }
   0xd   :  { %p243_p7 = pnand %p242_p6, %p236_p3 }
   0xf   :  { %246 = shalt.err (!%p243_p7)
}
  0x10   :  { %s274_s22 = smov 64   ;;  %s275_s23 = smov 4  }
  0x11   :  { %23 = dma.hbm_to_vmem [thread:$0]  %s331_s1, 1024, %s18_s13, [#allocation4], %s274_s22, %s274_s22, %s275_s23  }
  0x12   :  { %269 = dma.done.wait [#allocation4], 1024  }
  0x13   :  { %270 = vsyncadd [#allocation4], 4294966272  ;;  %v276_v0 = vmov 0.0   ;;  %vm277_vm0 = vmmov 0   ;;  %v278_v1 = vmov 0   ;;  %v217_v2 = vld [vmem:[#allocation3] sm:$0xff]  }
  0x14   :  { %189 = vmatprep.subr.bf16.mxu0 %v276_v0  ;;  %205 = vmatprep.mubr.msk.bf16.mxu0 %vm277_vm0, %v276_v0  ;;  %v218_v3 = vld [vmem:[#allocation3 + $0x8] sm:$0xff]   ;;  %v219_v4 = vld [vmem:[#allocation3 + $0x10] sm:$0xff]   ;;  %v147_v5 = vld [vmem:[%s332_s2] sm:$0xff]  ;;  %s279_s2 = smov [#allocation6]  }
  0x15   :  { %216 = vset.pattern.permute.xlu0 %v278_v1  ;;  %190 = vmatpush3.bf16.msra.mxu0 %v217_v2  ;;  %v220_v6 = vld [vmem:[#allocation3 + $0x18] sm:$0xff]   ;;  %v221_v7 = vld [vmem:[#allocation3 + $0x20] sm:$0xff]   ;;  %v222_v8 = vld [vmem:[#allocation3 + $0x28] sm:$0xff]   ;;  %s163_s29 = sshll.u32 %s279_s2, 4  ;;  %s164_s29 = int_to_ptr.vmem [resolvable:$true] %s163_s29 }
  0x16   :  { %191 = vmatprep.subr.bf16.mxu0 %v276_v0  ;;  %150 = vperm.xlu0 %216, %v147_v5   ;;  %v223_v9 = vld [vmem:[#allocation3 + $0x30] sm:$0xff]   ;;  %v224_v10 = vld [vmem:[#allocation3 + $0x38] sm:$0xff]   ;;  %v36_v11 = vld [vmem:[%s330_s0] sm:$0xf]  ;;  %s247_s30 = scalar_lea.vmem %s164_s29, 64  ;;  %p252_p9 = scmp.lt.s32.totalorder %s164_s29, %s164_s29 }
  0x17   :  { %p248_p8 = scmp.ne.s32.totalorder %s164_s29, %s247_s30  ;;  %p253_p10 = scmp.lt.s32.totalorder %s247_s30, %s247_s30 }
  0x19   :  { %192 = vmatpush3.bf16.msra.mxu0 %v218_v3  ;;  %p254_p11 = por %p253_p10, %p252_p9 }
  0x1a   :  { %193 = vmatprep.subr.bf16.mxu0 %v276_v0 }
  0x1b   :  { %p255_p12 = pnand %p254_p11, %p248_p8 }
  0x1d   :  { %194 = vmatpush3.bf16.msra.mxu0 %v219_v4 }
  0x1e   :  { %195 = vmatprep.subr.bf16.mxu0 %v276_v0 }
  0x21   :  { %196 = vmatpush3.bf16.msra.mxu0 %v220_v6 }
  0x22   :  { %197 = vmatprep.subr.bf16.mxu0 %v276_v0 }
  0x25   :  { %198 = vmatpush3.bf16.msra.mxu0 %v221_v7 }
  0x26   :  { %199 = vmatprep.subr.bf16.mxu0 %v276_v0 }
  0x29   :  { %200 = vmatpush3.bf16.msra.mxu0 %v222_v8 }
  0x2a   :  { %201 = vmatprep.subr.bf16.mxu0 %v276_v0 }
  0x2d   :  { %202 = vmatpush3.bf16.msra.mxu0 %v223_v9 }
  0x2e   :  { %203 = vmatprep.subr.bf16.mxu0 %v276_v0 }
  0x31   :  { %204 = vmatpush3.bf16.msra.mxu0 %v224_v10 }
  0x34   :  { %206 = vmatmul.mubr.bf16.vlgmr.msra.gmra.mrb[0].mxu0 %v36_v11 }
  0x95   :  { %v151_v12 = vpop.permute.xlu0 %150 }
 0x107   :  { %v135_v13 = vpop.f32.mrb[0].mxu0 }
 0x108   :  { %v153_v14 = vadd.f32 %v151_v12, %v135_v13  ;;  %v207_v15 = vpop.f32.mrb[1].mxu0 }
 0x109   :  { %v138_v16 = vpop.f32.mrb[2].mxu0 }
 0x10a   :  { %v154_v17 = vmax.f32 %v153_v14, 0.0  ;;  %v208_v18 = vpop.f32.mrb[3].mxu0 }
 0x10c   :  { %v155_v19 = vpack.c.bf16 %v154_v17, %v154_v17 }
 0x10e   :  { %156 = vst [vmem:[#allocation6] sm:$0xf] %v155_v19 }
 0x10f   :  { %258 = shalt.err (!%p255_p12)
}
 0x110   :  { %s259_s5 = scalar_lea.hbm %s333_s3, 64 }
 0x111   :  { %p260_p13 = scmp.ne.s32.totalorder %s333_s3, %s259_s5  ;;  %p263_p0 = scmp.lt.u32.totalorder %s259_s5, %s333_s3 }
 0x113   :  { %p265_p1 = pnand %p263_p0, %p260_p13 }
 0x115   :  { %268 = shalt.err (!%p265_p1)
}
 0x116   :  { %166 = dma.vmem_to_hbm [thread:$0]  %s164_s29, 64, %s333_s3, [#allocation5]  }
 0x117   :  { %271 = dma.done.wait [#allocation5], 64  }
 0x118   :  { %272 = vsyncadd [#allocation5], 4294967232 }
 0x119   :  { %170 = vsyncpa [#allocation4], 1 }
 0x11a   :  { %171 = vsyncpa [#allocation5], 1 }

</bundles_post_ra>
